<compile_context>
chip_gen: v6e
topology: v6e:2x2x1
jax: 0.10.0
libtpu: 0.0.40
codegen_flags: <defaults>
</compile_context>

<pallas_src>
import jax
import jax.numpy as jnp
from jax.experimental import pallas as pl
from jax.experimental.pallas import tpu as pltpu

D_IN = 28 * 28   # 784
H1 = 128
H2 = 64
D_OUT = 10


def mlp_kernel(x_ref, w1_ref, b1_ref, w2_ref, b2_ref, w3_ref, b3_ref, o_ref):
    # Layer 1: (TB, 784)f32 -> bf16 cast in-kernel, @ (784, 128)bf16 -> f32 acc
    x = x_ref[...].astype(jnp.bfloat16)
    h1 = jnp.dot(x, w1_ref[...], preferred_element_type=jnp.float32)
    h1 = jnp.maximum(h1 + b1_ref[...], 0.0)
    # Layer 2: (TB, 128)bf16 @ (128, 64)bf16 -> f32 acc, + bias, ReLU
    h2 = jnp.dot(h1.astype(jnp.bfloat16), w2_ref[...],
                 preferred_element_type=jnp.float32)
    h2 = jnp.maximum(h2 + b2_ref[...], 0.0)
    # Layer 3: (TB, 64)bf16 @ (64, 10)bf16 -> f32 acc, + bias (no activation)
    out = jnp.dot(h2.astype(jnp.bfloat16), w3_ref[...],
                  preferred_element_type=jnp.float32)
    o_ref[...] = (out + b3_ref[...]).astype(o_ref.dtype)


def _round_up(x, m):
    return (x + m - 1) // m * m


def mlp_forward(x, params, *, tb=2048):
    """x: (B, 1, 28, 28) or (B, 784). params: output of prepare_params.
    Returns (B, 10) float32 logits."""
    w1, b1, w2, b2, w3, b3 = params
    x2d = x.reshape(-1, D_IN)          # torch: x.view(-1, 784); no copy, no cast
    B = x2d.shape[0]

    # Batch tile: multiple of 8 (sublane), capped at `tb`, sized so the grid has
    # >= 2 steps when B allows it (v7x megacore). Tiny batches use TB == B
    # (block dim == full array dim is legal). Ragged last tiles are masked.
    if B <= 8:
        TB = B
    else:
        TB = max(8, min(tb, _round_up(pl.cdiv(B, 2), 8)))
    grid = (pl.cdiv(B, TB),)

    const = lambda shape: pl.BlockSpec(shape, lambda i: (0, 0))

    weight_elems = D_IN * H1 + H1 * H2 + H2 * D_OUT
    cost = pl.CostEstimate(
        flops=2 * B * weight_elems,
        transcendentals=0,
        bytes_accessed=(B * D_IN * x2d.dtype.itemsize   # input, read once
                        + weight_elems * 2              # bf16 weights (resident)
                        + (H1 + H2 + D_OUT) * 4         # f32 biases
                        + B * D_OUT * 4))               # f32 logits

    return pl.pallas_call(
        mlp_kernel,
        out_shape=jax.ShapeDtypeStruct((B, D_OUT), jnp.float32),
        grid=grid,
        in_specs=[
            pl.BlockSpec((TB, D_IN), lambda i: (i, 0)),   # batch-tiled input stream
            const((D_IN, H1)), const((1, H1)),            # weights/biases stay
            const((H1, H2)),   const((1, H2)),            # VMEM-resident
            const((H2, D_OUT)), const((1, D_OUT)),
        ],
        out_specs=pl.BlockSpec((TB, D_OUT), lambda i: (i, 0)),
        compiler_params=pltpu.CompilerParams(
            dimension_semantics=("parallel",)),
        cost_estimate=cost,
    )(x2d, w1, b1, w2, b2, w3, b3)


def prepare_params(params):
    """One-time (outside jit) cast/reshape: bf16 (in,out) weights, f32 (1,out) biases."""
    w1, b1, w2, b2, w3, b3 = params
    return (w1.astype(jnp.bfloat16), b1.reshape(1, H1).astype(jnp.float32),
            w2.astype(jnp.bfloat16), b2.reshape(1, H2).astype(jnp.float32),
            w3.astype(jnp.bfloat16), b3.reshape(1, D_OUT).astype(jnp.float32))


def init_params(key):
    """Deterministic init matching nn.Linear shapes (weights stored (in, out))."""
    ks = jax.random.split(key, 6)

    def linear(kw, kb, fan_in, fan_out):
        bound = 1.0 / jnp.sqrt(fan_in)  # torch default: U(-1/sqrt(fan_in), ...)
        w = jax.random.uniform(kw, (fan_in, fan_out), jnp.float32, -bound, bound)
        b = jax.random.uniform(kb, (1, fan_out), jnp.float32, -bound, bound)
        return w, b

    w1, b1 = linear(ks[0], ks[1], D_IN, H1)
    w2, b2 = linear(ks[2], ks[3], H1, H2)
    w3, b3 = linear(ks[4], ks[5], H2, D_OUT)
    return (w1, b1, w2, b2, w3, b3)


if __name__ == "__main__":
    key = jax.random.PRNGKey(0)
    k_x, k_p = jax.random.split(key)

    params = prepare_params(init_params(k_p))     # cast once, outside jit

    # MNIST-like input, NCHW as PyTorch would receive it (small demo batch).
    x = jax.random.normal(k_x, (2, 1, 28, 28), dtype=jnp.float32)

    out = jax.jit(mlp_forward)(x, params)
    out = jax.block_until_ready(out)
    assert out.shape == (2, 10)

    # Reference: same bf16-weight / f32-accumulation math in plain JAX.
    w1, b1, w2, b2, w3, b3 = params
    xb = x.reshape(-1, D_IN).astype(jnp.bfloat16)
    ref = jnp.maximum(
        jnp.dot(xb, w1, preferred_element_type=jnp.float32) + b1, 0.0)
    ref = jnp.maximum(
        jnp.dot(ref.astype(jnp.bfloat16), w2,
                preferred_element_type=jnp.float32) + b2, 0.0)
    ref = jnp.dot(ref.astype(jnp.bfloat16), w3,
                  preferred_element_type=jnp.float32) + b3
    assert jnp.allclose(out, ref, atol=2e-2, rtol=2e-2), (
        float(jnp.max(jnp.abs(out - ref))))

    print("KERNEL_OK")
</pallas_src>

<mosaic_0001>
module attributes {stable_mosaic.version = 11 : i64} {
  func.func @mlp_kernel(%arg0: i32, %arg1: memref<2x784xf32, #tpu.memory_space<vmem>>, %arg2: memref<784x128xbf16, #tpu.memory_space<vmem>>, %arg3: memref<1x128xf32, #tpu.memory_space<vmem>>, %arg4: memref<128x64xbf16, #tpu.memory_space<vmem>>, %arg5: memref<1x64xf32, #tpu.memory_space<vmem>>, %arg6: memref<64x10xbf16, #tpu.memory_space<vmem>>, %arg7: memref<1x10xf32, #tpu.memory_space<vmem>>, %arg8: memref<2x10xf32, #tpu.memory_space<vmem>>) attributes {dimension_semantics = [#tpu.dimension_semantics<parallel>], iteration_bounds = array<i64: 1>, scalar_prefetch = 0 : i64, scratch_operands = 0 : i64, tpu.core_type = #tpu.core_type<tc>, window_params = [{transform_indices = @transform_0, window_bounds = array<i64: 2, 784>}, {pipeline_mode = #tpu.pipeline_mode<synchronous>, transform_indices = @transform_1, window_bounds = array<i64: 784, 128>}, {pipeline_mode = #tpu.pipeline_mode<synchronous>, transform_indices = @transform_2, window_bounds = array<i64: 1, 128>}, {pipeline_mode = #tpu.pipeline_mode<synchronous>, transform_indices = @transform_3, window_bounds = array<i64: 128, 64>}, {pipeline_mode = #tpu.pipeline_mode<synchronous>, transform_indices = @transform_4, window_bounds = array<i64: 1, 64>}, {pipeline_mode = #tpu.pipeline_mode<synchronous>, transform_indices = @transform_5, window_bounds = array<i64: 64, 10>}, {pipeline_mode = #tpu.pipeline_mode<synchronous>, transform_indices = @transform_6, window_bounds = array<i64: 1, 10>}, {transform_indices = @transform_7, window_bounds = array<i64: 2, 10>}]} {
    %c0 = arith.constant 0 : index
    %c0_0 = arith.constant 0 : index
    %0 = vector.load %arg1[%c0, %c0_0] : memref<2x784xf32, #tpu.memory_space<vmem>>, vector<2x784xf32>
    %1 = arith.truncf %0 : vector<2x784xf32> to vector<2x784xbf16>
    %c0_1 = arith.constant 0 : index
    %c0_2 = arith.constant 0 : index
    %2 = vector.load %arg2[%c0_1, %c0_2] : memref<784x128xbf16, #tpu.memory_space<vmem>>, vector<784x128xbf16>
    %cst = arith.constant dense<0.000000e+00> : vector<2x128xf32>
    %3 = tpu.matmul %1, %2, %cst {dimension_numbers = #tpu.dot_dimension_numbers<[1], [0], [0], [1], [0, 0, 1, 1], [], []>} : vector<2x784xbf16>, vector<784x128xbf16>, vector<2x128xf32> -> vector<2x128xf32>
    %c0_3 = arith.constant 0 : index
    %c0_4 = arith.constant 0 : index
    %4 = vector.load %arg3[%c0_3, %c0_4] : memref<1x128xf32, #tpu.memory_space<vmem>>, vector<1x128xf32>
    %5 = vector.broadcast %4 : vector<1x128xf32> to vector<2x128xf32>
    %6 = arith.addf %3, %5 : vector<2x128xf32>
    %cst_5 = arith.constant 0.000000e+00 : f32
    %7 = vector.broadcast %cst_5 : f32 to vector<2x128xf32>
    %8 = arith.maximumf %6, %7 : vector<2x128xf32>
    %9 = arith.truncf %8 : vector<2x128xf32> to vector<2x128xbf16>
    %c0_6 = arith.constant 0 : index
    %c0_7 = arith.constant 0 : index
    %10 = vector.load %arg4[%c0_6, %c0_7] : memref<128x64xbf16, #tpu.memory_space<vmem>>, vector<128x64xbf16>
    %cst_8 = arith.constant dense<0.000000e+00> : vector<2x64xf32>
    %11 = tpu.matmul %9, %10, %cst_8 {dimension_numbers = #tpu.dot_dimension_numbers<[1], [0], [0], [1], [0, 0, 1, 1], [], []>} : vector<2x128xbf16>, vector<128x64xbf16>, vector<2x64xf32> -> vector<2x64xf32>
    %c0_9 = arith.constant 0 : index
    %c0_10 = arith.constant 0 : index
    %12 = vector.load %arg5[%c0_9, %c0_10] : memref<1x64xf32, #tpu.memory_space<vmem>>, vector<1x64xf32>
    %13 = vector.broadcast %12 : vector<1x64xf32> to vector<2x64xf32>
    %14 = arith.addf %11, %13 : vector<2x64xf32>
    %cst_11 = arith.constant 0.000000e+00 : f32
    %15 = vector.broadcast %cst_11 : f32 to vector<2x64xf32>
    %16 = arith.maximumf %14, %15 : vector<2x64xf32>
    %17 = arith.truncf %16 : vector<2x64xf32> to vector<2x64xbf16>
    %c0_12 = arith.constant 0 : index
    %c0_13 = arith.constant 0 : index
    %18 = vector.load %arg6[%c0_12, %c0_13] : memref<64x10xbf16, #tpu.memory_space<vmem>>, vector<64x10xbf16>
    %cst_14 = arith.constant dense<0.000000e+00> : vector<2x10xf32>
    %19 = tpu.matmul %17, %18, %cst_14 {dimension_numbers = #tpu.dot_dimension_numbers<[1], [0], [0], [1], [0, 0, 1, 1], [], []>} : vector<2x64xbf16>, vector<64x10xbf16>, vector<2x10xf32> -> vector<2x10xf32>
    %c0_15 = arith.constant 0 : index
    %c0_16 = arith.constant 0 : index
    %20 = vector.load %arg7[%c0_15, %c0_16] : memref<1x10xf32, #tpu.memory_space<vmem>>, vector<1x10xf32>
    %21 = vector.broadcast %20 : vector<1x10xf32> to vector<2x10xf32>
    %22 = arith.addf %19, %21 : vector<2x10xf32>
    %c0_17 = arith.constant 0 : index
    %c0_18 = arith.constant 0 : index
    %23 = vector.load %arg8[%c0_17, %c0_18] : memref<2x10xf32, #tpu.memory_space<vmem>>, vector<2x10xf32>
    tpu.vector_store %arg8[%c0_17, %c0_18], %22 {strides = array<i32>} : memref<2x10xf32, #tpu.memory_space<vmem>>, vector<2x10xf32>,
    return
  }
  func.func @transform_0(%arg0: i32) -> (i32, i32) {
    %c0_i32 = arith.constant 0 : i32
    %c0_i32_0 = arith.constant 0 : i32
    return %arg0, %c0_i32 : i32, i32
  }
  func.func @transform_1(%arg0: i32) -> (i32, i32) {
    %c0_i32 = arith.constant 0 : i32
    %c0_i32_0 = arith.constant 0 : i32
    %c0_i32_1 = arith.constant 0 : i32
    return %c0_i32, %c0_i32_0 : i32, i32
  }
  func.func @transform_2(%arg0: i32) -> (i32, i32) {
    %c0_i32 = arith.constant 0 : i32
    %c0_i32_0 = arith.constant 0 : i32
    %c0_i32_1 = arith.constant 0 : i32
    return %c0_i32, %c0_i32_0 : i32, i32
  }
  func.func @transform_3(%arg0: i32) -> (i32, i32) {
    %c0_i32 = arith.constant 0 : i32
    %c0_i32_0 = arith.constant 0 : i32
    %c0_i32_1 = arith.constant 0 : i32
    return %c0_i32, %c0_i32_0 : i32, i32
  }
  func.func @transform_4(%arg0: i32) -> (i32, i32) {
    %c0_i32 = arith.constant 0 : i32
    %c0_i32_0 = arith.constant 0 : i32
    %c0_i32_1 = arith.constant 0 : i32
    return %c0_i32, %c0_i32_0 : i32, i32
  }
  func.func @transform_5(%arg0: i32) -> (i32, i32) {
    %c0_i32 = arith.constant 0 : i32
    %c0_i32_0 = arith.constant 0 : i32
    %c0_i32_1 = arith.constant 0 : i32
    return %c0_i32, %c0_i32_0 : i32, i32
  }
  func.func @transform_6(%arg0: i32) -> (i32, i32) {
    %c0_i32 = arith.constant 0 : i32
    %c0_i32_0 = arith.constant 0 : i32
    %c0_i32_1 = arith.constant 0 : i32
    return %c0_i32, %c0_i32_0 : i32, i32
  }
  func.func @transform_7(%arg0: i32) -> (i32, i32) {
    %c0_i32 = arith.constant 0 : i32
    %c0_i32_0 = arith.constant 0 : i32
    return %arg0, %c0_i32 : i32, i32
  }
}

</mosaic_0001>

<bundles_post_ra>
// kernel: mlp_forward.1
= control target key start
LH: loop header
LB: loop body
LE: loop exit
PB: predicated region body
PF: predicated region fallthrough
CT: control target
= control target key end

     0   :  { %12 = vsyncpa [#allocation3], 0  ;;  %s1295_s0 = inlined_call_operand.vmem [shape: f32[2,784], index: 0, kind: input, shape index: {}]   ;;  %s1296_s1 = inlined_call_operand.hbm [shape: bf16[784,128], index: 1, kind: input, shape index: {}]   ;;  %s1297_s2 = inlined_call_operand.vmem [shape: f32[1,128], index: 2, kind: input, shape index: {}]   ;;  %s1298_s3 = inlined_call_operand.vmem [shape: bf16[128,64], index: 3, kind: input, shape index: {}]   ;;  %s1299_s4 = inlined_call_operand.vmem [shape: f32[1,64], index: 4, kind: input, shape index: {}]   ;;  %s1300_s5 = inlined_call_operand.vmem [shape: bf16[64,10], index: 5, kind: input, shape index: {}]   ;;  %s1301_s6 = inlined_call_operand.vmem [shape: f32[1,10], index: 6, kind: input, shape index: {}]   ;;  %s1302_s7 = inlined_call_operand.hbm [shape: f32[2,10], index: 7, kind: output, shape index: {}]  }
   0x1   :  { %13 = vsyncpa [#allocation4], 0  ;;  %s1171_s24 = smov [#allocation2]  }
   0x2   :  { %s21_s25 = sshll.u32 %s1171_s24, 4  ;;  %s22_s25 = int_to_ptr.vmem [resolvable:$true] %s21_s25 }
   0x3   :  { %s1135_s26 = scalar_lea.vmem %s22_s25, 6272  ;;  %p1140_p1 = scmp.lt.s32.totalorder %s22_s25, %s22_s25 }
   0x4   :  { %p1136_p0 = scmp.ne.s32.totalorder %s22_s25, %s1135_s26  ;;  %p1141_p2 = scmp.lt.s32.totalorder %s1135_s26, %s1135_s26 }
   0x6   :  { %p1142_p3 = por %p1141_p2, %p1140_p1 }
   0x8   :  { %p1143_p4 = pnand %p1142_p3, %p1136_p0 }
   0xa   :  { %1146 = shalt.err (!%p1143_p4)
}
   0xb   :  { %s1172_s27 = smov 64   ;;  %s1173_s28 = smov 4  }
   0xc   :  { %27 = dma.hbm_to_vmem [thread:$0]  %s1296_s1, 6272, %s22_s25, [#allocation3], %s1172_s27, %s1172_s27, %s1173_s28  }
   0xd   :  { %1167 = dma.done.wait [#allocation3], 6272  }
   0xe   :  { %1168 = vsyncadd [#allocation3], 4294961024  ;;  %v1064_v0 = vld [vmem:[#allocation2 + $0x78] sm:$0xff]   ;;  %v1068_v4 = vld [vmem:[#allocation2 + $0x70] sm:$0xff]   ;;  %v1174_v21 = vmov 1983009808   ;;  %v50_v23 = vlaneseq }
   0xf   :  { %v1065_v1 = vld [vmem:[#allocation2 + $0x38] sm:$0xff]   ;;  %937 = vmatprep.subr.bf16.mxu0 %v1064_v0  ;;  %v1069_v5 = vld [vmem:[#allocation2 + $0x30] sm:$0xff]   ;;  %v1072_v8 = vld [vmem:[#allocation2 + $0x68] sm:$0xff]   ;;  %v48_v22 = vunpack.c.l.s4 %v1174_v21  ;;  %v1175_v45 = vmov 0.0   ;;  %vm1176_vm0 = vmmov 0   ;;  %vm492_vm1 = vcmask 130048  }
  0x10   :  { %v1066_v2 = vld [vmem:[#allocation2 + $0xf8] sm:$0xff]   ;;  %938 = vmatpush3.bf16.msra.mxu0 %v1065_v1  ;;  %v1070_v6 = vld [vmem:[#allocation2 + $0xf0] sm:$0xff]   ;;  %v1073_v9 = vld [vmem:[#allocation2 + $0x28] sm:$0xff]   ;;  %v51_v29 = vshrl.u32 %v50_v23, 7  ;;  %vm810_vm2 = vcmask 523264   ;;  %s1177_s13 = smov [#allocation5]  }
  0x11   :  { %v1067_v3 = vld [vmem:[#allocation2 + $0xb8] sm:$0xff]   ;;  %959 = vmatprep.subr.bf16.mxu1 %v1066_v2  ;;  %939 = vmatprep.subr.bf16.mxu0 %v1068_v4  ;;  %v1071_v7 = vld [vmem:[#allocation2 + $0xb0] sm:$0xff]   ;;  %v1074_v10 = vld [vmem:[#allocation2 + $0xe8] sm:$0xff]   ;;  %v49_v28 = vunpack.c.0.s8 %v48_v22  ;;  %vm854_vm3 = vcmask 74752  }
  0x12   :  { %960 = vmatpush3.bf16.msra.mxu1 %v1067_v3  ;;  %v1075_v11 = vld [vmem:[#allocation2 + $0xa8] sm:$0xff]   ;;  %v1076_v12 = vld [vmem:[#allocation2 + $0x60] sm:$0xff]   ;;  %v1080_v16 = vld [vmem:[#allocation2 + $0x58] sm:$0xff]  }
  0x13   :  { %961 = vmatprep.subr.bf16.mxu1 %v1070_v6  ;;  %v1077_v13 = vld [vmem:[#allocation2 + $0x20] sm:$0xff]   ;;  %v1081_v17 = vld [vmem:[#allocation2 + $0x18] sm:$0xff]   ;;  %v1084_v20 = vld [vmem:[#allocation2 + $0x50] sm:$0xff]   ;;  %v52_v34 = vsub.s32 %v49_v28, %v51_v29 }
  0x14   :  { %940 = vmatpush3.bf16.msra.mxu0 %v1069_v5  ;;  %v1078_v14 = vld [vmem:[#allocation2 + $0xe0] sm:$0xff]   ;;  %v1082_v18 = vld [vmem:[#allocation2 + $0xd8] sm:$0xff]   ;;  %v1085_v24 = vld [vmem:[#allocation2 + $0x10] sm:$0xff]  }
  0x15   :  { %941 = vmatprep.subr.bf16.mxu0 %v1072_v8  ;;  %v1079_v15 = vld [vmem:[#allocation2 + $0xa0] sm:$0xff]   ;;  %v1083_v19 = vld [vmem:[#allocation2 + $0x98] sm:$0xff]   ;;  %v1086_v25 = vld [vmem:[#allocation2 + $0xd0] sm:$0xff]  }
  0x16   :  { %962 = vmatpush3.bf16.msra.mxu1 %v1071_v7  ;;  %v1087_v26 = vld [vmem:[#allocation2 + $0x90] sm:$0xff]   ;;  %v1088_v27 = vld [vmem:[#allocation2 + $0x48] sm:$0xff]   ;;  %v1092_v33 = vld [vmem:[#allocation2 + $0x40] sm:$0xff]  }
  0x17   :  { %963 = vmatprep.subr.bf16.mxu1 %v1074_v10  ;;  %v1089_v30 = vld [vmem:[#allocation2 + $0x8] sm:$0xff]   ;;  %v1093_v35 = vld [vmem:[#allocation2] sm:$0xff]   ;;  %v1096_v41 = vld [vmem:[#allocation2 + $0x178] sm:$0xff]  }
  0x18   :  { %942 = vmatpush3.bf16.msra.mxu0 %v1073_v9  ;;  %v1090_v31 = vld [vmem:[#allocation2 + $0xc8] sm:$0xff]   ;;  %v1094_v36 = vld [vmem:[#allocation2 + $0xc0] sm:$0xff]   ;;  %v1098_v48 = vld [vmem:[#allocation2 + $0x138] sm:$0xff]  }
  0x19   :  { %943 = vmatprep.subr.bf16.mxu0 %v1076_v12  ;;  %v1091_v32 = vld [vmem:[#allocation2 + $0x88] sm:$0xff]   ;;  %v42_v37 = vld [vmem:[%s1295_s0] sm:$0xff]  ;;  %v1099_v50 = vld [vmem:[#allocation2 + $0x170] sm:$0xff]  }
  0x1a   :  { %964 = vmatpush3.bf16.msra.mxu1 %v1075_v11  ;;  %v53_v38 = vrot.slane %v42_v37, %v52_v34  ;;  %v1095_v39 = vld [vmem:[#allocation2 + $0x80] sm:$0xff]   ;;  %v46_v40 = vcombine.high %v42_v37, %v42_v37  ;;  %v1100_v52 = vld [vmem:[#allocation2 + $0x130] sm:$0xff]   ;;  %v1101_v53 = vld [vmem:[#allocation2 + $0x168] sm:$0xff]  }
  0x1b   :  { %965 = vmatprep.subr.bf16.mxu1 %v1078_v14  ;;  %v1102_v54 = vld [vmem:[#allocation2 + $0x128] sm:$0xff]   ;;  %v1103_v55 = vld [vmem:[#allocation2 + $0x160] sm:$0xff]   ;;  %v1105_v57 = vld [vmem:[#allocation2 + $0x158] sm:$0xff]  }
  0x1c   :  { %944 = vmatpush3.bf16.msra.mxu0 %v1077_v13  ;;  %v61_v42 = vcombine.high %v53_v38, %v53_v38  ;;  %v60_v43 = vrot.slane %v46_v40, %v52_v34  ;;  %v86_v44 = vpack.c.bf16 %v53_v38, %v53_v38  ;;  %v1104_v56 = vld [vmem:[#allocation2 + $0x120] sm:$0xff]   ;;  %v43_v59 = vld [vmem:[%s1295_s0 + $0x8] sm:$0x3f]  ;;  %v1106_v60 = vld [vmem:[#allocation2 + $0x118] sm:$0xff]  }
  0x1d   :  { %945 = vmatprep.subr.bf16.mxu0 %v1080_v16  ;;  %v1113_v58 = vld [vmem:[#allocation2 + $0x180] sm:$0xff]   ;;  %v63_v61 = vcombine.high %v43_v59, %v43_v59  ;;  %v70_v62 = vrot.slane %v43_v59, %v52_v34  ;;  %v1107_v63 = vld [vmem:[#allocation2 + $0x150] sm:$0xff]   ;;  %v1109_v5 = vld [vmem:[#allocation2 + $0x148] sm:$0xff]  }
  0x1e   :  { %966 = vmatpush3.bf16.msra.mxu1 %v1079_v15  ;;  %v87_v46 = vpack.c.bf16 %v61_v42, %v61_v42  ;;  %v62_v47 = vcombine.high %v60_v43, %v60_v43  ;;  %v88_v49 = vpack.c.bf16 %v60_v43, %v60_v43  ;;  %v1108_v2 = vld [vmem:[#allocation2 + $0x110] sm:$0xff]   ;;  %v1110_v6 = vld [vmem:[#allocation2 + $0x108] sm:$0xff]   ;;  %v1111_v7 = vld [vmem:[#allocation2 + $0x140] sm:$0xff]  }
  0x1f   :  { %967 = vmatprep.subr.bf16.mxu1 %v1082_v18  ;;  %v77_v0 = vrot.slane %v63_v61, %v52_v34  ;;  %v78_v1 = vcombine.high %v70_v62, %v70_v62  ;;  %v1112_v8 = vld [vmem:[#allocation2 + $0x100] sm:$0xff]   ;;  %v90_v9 = vpack.c.bf16 %v70_v62, %v70_v62  ;;  %v1115_v10 = vld [vmem:[%s1298_s3 + $0x38] sm:$0xff]   ;;  %v1116_v11 = vld [vmem:[%s1298_s3 + $0x30] sm:$0xff]  }
  0x20   :  { %946 = vmatpush3.bf16.msra.mxu0 %v1081_v17  ;;  %528 = vmatprep.mubr.bf16.mxu0 %v87_v46  ;;  %v89_v51 = vpack.c.bf16 %v62_v47, %v62_v47  ;;  %v1117_v12 = vld [vmem:[%s1298_s3 + $0x28] sm:$0xff]   ;;  %v1118_v13 = vld [vmem:[%s1298_s3 + $0x20] sm:$0xff]   ;;  %v1119_v14 = vld [vmem:[%s1298_s3 + $0x18] sm:$0xff]  }
  0x21   :  { %947 = vmatprep.subr.bf16.mxu0 %v1084_v20  ;;  %v91_v3 = vpack.c.bf16 %v78_v1, %v78_v1  ;;  %v92_v4 = vpack.c.bf16 %v77_v0, %v77_v0  ;;  %v1120_v15 = vld [vmem:[%s1298_s3 + $0x10] sm:$0xff]   ;;  %v1121_v16 = vld [vmem:[%s1298_s3 + $0x8] sm:$0xff]   ;;  %v1122_v17 = vld [vmem:[%s1298_s3] sm:$0xff]  }
  0x22   :  { %968 = vmatpush3.bf16.msra.mxu1 %v1083_v19  ;;  %568 = vmatprep.mubr.bf16.mxu1 %v89_v51  ;;  %v1123_v18 = vld [vmem:[%s1300_s5 + $0x18] sm:$0xff]   ;;  %v1124_v19 = vld [vmem:[%s1300_s5 + $0x10] sm:$0xff]   ;;  %v1125_v47 = vld [vmem:[%s1300_s5 + $0x8] sm:$0xff]  }
  0x23   :  { %969 = vmatprep.subr.bf16.mxu1 %v1086_v25 }
  0x24   :  { %948 = vmatpush3.bf16.msra.mxu0 %v1085_v24 }
  0x25   :  { %949 = vmatprep.subr.bf16.mxu0 %v1088_v27 }
  0x26   :  { %970 = vmatpush3.bf16.msra.mxu1 %v1087_v26 }
  0x27   :  { %971 = vmatprep.subr.bf16.mxu1 %v1090_v31 }
  0x28   :  { %950 = vmatpush3.bf16.msra.mxu0 %v1089_v30 }
  0x29   :  { %951 = vmatprep.subr.bf16.mxu0 %v1092_v33  ;;  %v871_v33 = vld [vmem:[%s1297_s2] ss:$0 sm:$0xff] }
  0x2a   :  { %972 = vmatpush3.bf16.msra.mxu1 %v1091_v32 }
  0x2b   :  { %973 = vmatprep.subr.bf16.mxu1 %v1094_v36 }
  0x2c   :  { %952 = vmatpush3.bf16.msra.mxu0 %v1093_v35 }
  0x2d   :  { %981 = vmatprep.subr.bf16.mxu0 %v1096_v41 }
  0x2e   :  { %974 = vmatpush3.bf16.msra.mxu1 %v1095_v39 }
  0x2f   :  { %1019 = vmatprep.subr.bf16.mxu1 %v1175_v45  ;;  %529 = vmatmul.mubr.bf16.vlgmr.msra.gmra.mxu0 %v86_v44 }
  0x30   :  { %982 = vmatpush3.bf16.msra.mxu0 %v1098_v48  ;;  %608 = vmatprep.mubr.bf16.mxu0 %v91_v3  ;;  %v1126_v48 = vld [vmem:[%s1300_s5] sm:$0xff]   ;;  %s862_s5 = sshll.u32 %s1177_s13, 4  ;;  %s863_s5 = int_to_ptr.vmem [resolvable:$true] %s862_s5 }
  0x31   :  { %569 = vmatmul.mubr.bf16.vlgmr.msra.gmra.mxu1 %v88_v49  ;;  %983 = vmatprep.subr.bf16.mxu0 %v1099_v50  ;;  %v922_v49 = vld [vmem:[%s1299_s4] ss:$0 sm:$0xff]  ;;  %s1147_s4 = scalar_lea.vmem %s863_s5, 32  ;;  %p1152_p6 = scmp.lt.s32.totalorder %s863_s5, %s863_s5 }
  0x32   :  { %1021 = vmatprep.mubr.msk.bf16.mxu1 %vm1176_vm0, %v1175_v45  ;;  %1020 = vmatpush3.bf16.msra.mxu1 %v1113_v58  ;;  %p1148_p5 = scmp.ne.s32.totalorder %s863_s5, %s1147_s4  ;;  %p1153_p7 = scmp.lt.s32.totalorder %s1147_s4, %s1147_s4 }
  0x33   :  { %1025 = vmatprep.subr.bf16.mxu1 %v1175_v45 }
  0x34   :  { %984 = vmatpush3.bf16.msra.mxu0 %v1100_v52  ;;  %p1154_p8 = por %p1153_p7, %p1152_p6 }
  0x35   :  { %985 = vmatprep.subr.bf16.mxu0 %v1101_v53 }
  0x36   :  { %p1155_p9 = pnand %p1154_p8, %p1148_p5 }
  0x38   :  { %986 = vmatpush3.bf16.msra.mxu0 %v1102_v54 }
  0x39   :  { %987 = vmatprep.subr.bf16.mxu0 %v1103_v55  ;;  %1022 = vmatmul.mubr.msk.bf16.vlgmr.msra.gmra.mxu1 %vm492_vm1, %v92_v4 }
  0x3a   :  { %1041 = vmatprep.mubr.msk.bf16.mxu1 %vm1176_vm0, %v1175_v45  ;;  %1026 = vmatpush3.bf16.msra.mxu1 %v1115_v10 }
  0x3b   :  { %1027 = vmatprep.subr.bf16.mxu1 %v1175_v45 }
  0x3c   :  { %988 = vmatpush3.bf16.msra.mxu0 %v1104_v56 }
  0x3d   :  { %989 = vmatprep.subr.bf16.mxu0 %v1105_v57 }
  0x3e   :  { %1028 = vmatpush3.bf16.msra.mxu1 %v1116_v11 }
  0x3f   :  { %1029 = vmatprep.subr.bf16.mxu1 %v1175_v45 }
  0x40   :  { %990 = vmatpush3.bf16.msra.mxu0 %v1106_v60 }
  0x41   :  { %991 = vmatprep.subr.bf16.mxu0 %v1107_v63 }
  0x42   :  { %1030 = vmatpush3.bf16.msra.mxu1 %v1117_v12 }
  0x43   :  { %1031 = vmatprep.subr.bf16.mxu1 %v1175_v45 }
  0x44   :  { %992 = vmatpush3.bf16.msra.mxu0 %v1108_v2 }
  0x45   :  { %993 = vmatprep.subr.bf16.mxu0 %v1109_v5 }
  0x46   :  { %1032 = vmatpush3.bf16.msra.mxu1 %v1118_v13 }
  0x47   :  { %1033 = vmatprep.subr.bf16.mxu1 %v1175_v45 }
  0x48   :  { %994 = vmatpush3.bf16.msra.mxu0 %v1110_v6 }
  0x49   :  { %995 = vmatprep.subr.bf16.mxu0 %v1111_v7 }
  0x4a   :  { %1034 = vmatpush3.bf16.msra.mxu1 %v1119_v14 }
  0x4b   :  { %1035 = vmatprep.subr.bf16.mxu1 %v1175_v45 }
  0x4c   :  { %996 = vmatpush3.bf16.msra.mxu0 %v1112_v8 }
  0x4d   :  { %1045 = vmatprep.subr.bf16.mxu0 %v1175_v45 }
  0x4e   :  { %1036 = vmatpush3.bf16.msra.mxu1 %v1120_v15 }
  0x4f   :  { %609 = vmatmul.mubr.bf16.vlgmr.msra.gmra.mxu0 %v90_v9  ;;  %1037 = vmatprep.subr.bf16.mxu1 %v1175_v45 }
  0x50   :  { %1053 = vmatprep.mubr.msk.bf16.mxu0 %vm1176_vm0, %v1175_v45  ;;  %1046 = vmatpush3.bf16.msra.mxu0 %v1123_v18 }
  0x51   :  { %1047 = vmatprep.subr.bf16.mxu0 %v1175_v45 }
  0x52   :  { %1038 = vmatpush3.bf16.msra.mxu1 %v1121_v16 }
  0x53   :  { %1039 = vmatprep.subr.bf16.mxu1 %v1175_v45 }
  0x54   :  { %1048 = vmatpush3.bf16.msra.mxu0 %v1124_v19 }
  0x55   :  { %1049 = vmatprep.subr.bf16.mxu0 %v1175_v45 }
  0x56   :  { %1040 = vmatpush3.bf16.msra.mxu1 %v1122_v17 }
  0x58   :  { %1050 = vmatpush3.bf16.msra.mxu0 %v1125_v47 }
  0x59   :  { %1051 = vmatprep.subr.bf16.mxu0 %v1175_v45  ;;  %v931_v45 = vld [vmem:[%s1301_s6] ss:$0 sm:$0xff] }
  0x5c   :  { %1052 = vmatpush3.bf16.msra.mxu0 %v1126_v48 }
  0xef   :  { %v953_v20 = vpop.f32.mrf.mxu0 }
  0xf1   :  { %v954_v21 = vpop.f32.mrf.mxu0  ;;  %v975_v22 = vpop.f32.mrf.mxu1 }
  0xf2   :  { %v955_v32 = vadd.f32 %v954_v21, %v953_v20 }
  0xf3   :  { %v956_v23 = vpop.f32.mrf.mxu0  ;;  %v976_v24 = vpop.f32.mrf.mxu1 }
  0xf4   :  { %v531_v34 = vadd.f32 %v955_v32, %v871_v33  ;;  %v977_v35 = vadd.f32 %v976_v24, %v975_v22 }
  0xf5   :  { %v957_v25 = vpop.f32.mrf.mxu0  ;;  %v978_v26 = vpop.f32.mrf.mxu1 }
  0xf6   :  { %v571_v38 = vadd.f32 %v977_v35, %v531_v34 }
  0xf7   :  { %v979_v27 = vpop.f32.mrf.mxu1 }
  0xf9   :  { %v650_v28 = vpop.f32.mrf.mxu1 }
  0xfb   :  { %v1023_v29 = vpop.f32.mrf.mxu1 }
  0xfd   :  { %v653_v30 = vpop.f32.mrf.mxu1 }
  0xff   :  { %v1024_v31 = vpop.f32.mrf.mxu1 }
 0x10f   :  { %v997_v36 = vpop.f32.mrf.mxu0 }
 0x111   :  { %v998_v37 = vpop.f32.mrf.mxu0 }
 0x112   :  { %v999_v39 = vadd.f32 %v998_v37, %v997_v36 }
 0x113   :  { %v1000_v40 = vpop.f32.mrf.mxu0 }
 0x114   :  { %v611_v41 = vadd.f32 %v999_v39, %v571_v38 }
 0x115   :  { %v1001_v42 = vpop.f32.mrf.mxu0 }
 0x116   :  { %v651_v43 = vadd.f32 %v650_v28, %v611_v41 }
 0x118   :  { %v656_v44 = vmax.f32 %v651_v43, 0.0 }
 0x11a   :  { %v657_v46 = vpack.c.bf16 %v656_v44, %v656_v44 }
 0x11c   :  { %1042 = vmatmul.mubr.bf16.vlgmr.msra.gmra.mxu1 %v657_v46 }
 0x1dc   :  { %v763_v50 = vpop.f32.mrf.mxu1 }
 0x1dd   :  { %v764_v51 = vadd.f32 %v922_v49, %v763_v50 }
 0x1de   :  { %v1043_v52 = vpop.f32.mrf.mxu1 }
 0x1df   :  { %v769_v53 = vmax.f32 %v764_v51, 0.0 }
 0x1e0   :  { %v766_v54 = vpop.f32.mrf.mxu1 }
 0x1e1   :  { %v770_v55 = vpack.c.bf16 %v769_v53, %v769_v53 }
 0x1e2   :  { %v1044_v56 = vpop.f32.mrf.mxu1 }
 0x1e3   :  { %1054 = vmatmul.mubr.msk.bf16.vlgmr.msra.gmra.mxu0 %vm810_vm2, %v770_v55 }
 0x2a3   :  { %v848_v57 = vpop.f32.mrf.mxu0 }
 0x2a4   :  { %v849_v58 = vadd.f32 %v931_v45, %v848_v57 }
 0x2a5   :  { %v1055_v59 = vpop.f32.mrf.mxu0 }
 0x2a6   :  { %855 = vst.msk [vmem:[#allocation5] sm:$0x3] %vm854_vm3, %v849_v58 }
 0x2a7   :  { %v851_v60 = vpop.f32.mrf.mxu0 }
 0x2a8   :  { %1158 = shalt.err (!%p1155_p9)
}
 0x2a9   :  { %865 = dma.vmem_to_hbm [thread:$0]  %s863_s5, 32, %s1302_s7, [#allocation4]   ;;  %v1056_v61 = vpop.f32.mrf.mxu0 }
 0x2aa   :  { %1169 = dma.done.wait [#allocation4], 32  }
 0x2ab   :  { %1170 = vsyncadd [#allocation4], 4294967264 }
 0x2ac   :  { %869 = vsyncpa [#allocation3], 1 }
 0x2ad   :  { %870 = vsyncpa [#allocation4], 1 }

</bundles_post_ra>
